<compile_context>
chip_gen: v5e
topology: v5e:2x2
jax: 0.10.0
libtpu: 0.0.40
codegen_flags: <defaults>
</compile_context>

<pallas_src>
import functools

import numpy as np
import jax
import jax.numpy as jnp
from jax.experimental import pallas as pl
from jax.experimental.pallas import tpu as pltpu


def _round_up(x, m):
    return ((x + m - 1) // m) * m


# ----------------------------------------------------------------------------
# Kernel 1: tiled matmul + bias, with fused epilogue
# ----------------------------------------------------------------------------
def _matmul_bias_kernel(x_ref, w_ref, b_ref, o_ref, acc_ref, *,
                        epilogue, n_valid, log_pmin):
    """grid (M/tm, N/tn, K/tk); f32 accumulator; epilogue on the last K step."""
    @pl.when(pl.program_id(2) == 0)
    def _init():
        acc_ref[...] = jnp.zeros_like(acc_ref)

    acc_ref[...] += jnp.dot(x_ref[...], w_ref[...],
                            preferred_element_type=jnp.float32)

    @pl.when(pl.program_id(2) == pl.num_programs(2) - 1)
    def _finalize():
        out = acc_ref[...] + b_ref[...]          # bias broadcast over rows (f32)
        if epilogue == "relu":
            out = jnp.maximum(out, 0.0)
        elif epilogue == "log_softmax_clamp":
            # mask padded class lanes before the max / logsumexp
            col = jax.lax.broadcasted_iota(jnp.int32, out.shape, 1)
            out = jnp.where(col < n_valid, out, -1e30)
            m = jnp.max(out, axis=-1, keepdims=True)
            s = out - m
            lse = jnp.log(jnp.sum(jnp.exp(s), axis=-1, keepdims=True))
            out = s - lse
            if log_pmin is not None:
                out = jnp.maximum(out, log_pmin)
        o_ref[...] = out.astype(o_ref.dtype)


def pallas_matmul_bias(x, w, b, *, epilogue="none", log_pmin=None,
                       compute_dtype=jnp.bfloat16, out_dtype=jnp.float32):
    """out = epilogue(x @ w + b).  x:(M,K), w:(K,N), b:(N,).
    bf16 MXU inputs + f32 accumulation; small K is passed as one unpadded block."""
    M, K = x.shape
    K2, N = w.shape
    assert K2 == K
    tm = min(512, _round_up(M, 16))
    tn = 128
    Mp = _round_up(M, tm)
    Np = _round_up(N, tn)
    if K <= 1024:              # conv1/conv2/fc2: single K block, no HBM K padding
        tk, Kp = K, K
    else:                      # fc1: real K loop
        tk = 512
        Kp = _round_up(K, tk)
    grid = (Mp // tm, Np // tn, Kp // tk)
    if epilogue == "log_softmax_clamp":
        assert grid[1] == 1, "softmax epilogue needs all classes in one N tile"

    xp = x.astype(compute_dtype)
    if (Mp, Kp) != (M, K):
        xp = jnp.pad(xp, ((0, Mp - M), (0, Kp - K)))
    wp = w.astype(compute_dtype)
    if (Kp, Np) != (K, N):
        wp = jnp.pad(wp, ((0, Kp - K), (0, Np - N)))
    bp = b.astype(jnp.float32).reshape(1, N)
    if Np != N:
        bp = jnp.pad(bp, ((0, 0), (0, Np - N)))

    kernel = functools.partial(_matmul_bias_kernel, epilogue=epilogue,
                               n_valid=N, log_pmin=log_pmin)
    out = pl.pallas_call(
        kernel,
        out_shape=jax.ShapeDtypeStruct((Mp, Np), out_dtype),
        grid_spec=pltpu.PrefetchScalarGridSpec(
            num_scalar_prefetch=0, grid=grid,
            in_specs=[pl.BlockSpec((tm, tk), lambda i, j, k: (i, k)),
                      pl.BlockSpec((tk, tn), lambda i, j, k: (k, j)),
                      pl.BlockSpec((1, tn), lambda i, j, k: (0, j))],
            out_specs=pl.BlockSpec((tm, tn), lambda i, j, k: (i, j)),
            scratch_shapes=[pltpu.VMEM((tm, tn), jnp.float32)]),
        compiler_params=pltpu.CompilerParams(
            dimension_semantics=("parallel", "parallel", "arbitrary"),
            vmem_limit_bytes=32 * 1024 * 1024),
    )(xp, wp, bp)
    # TODO(synk): v7x small-batch fc latency could be halved by splitting the K
    # reduction across the two TensorCores; not done here (batch-independent path).
    return out[:M, :N]


def pallas_conv2d_nhwc(x_nhwc, weight_hwio, bias, *, stride=1, padding=0,
                       dilation=1, epilogue="relu",
                       compute_dtype=jnp.bfloat16, out_dtype=jnp.bfloat16):
    """F.conv2d (groups=1) on NHWC activations via wrapper im2col (built directly
    in bf16) + one Pallas matmul.  Weight is stored HWIO so its reshape is free."""
    N, H, W, Cin = x_nhwc.shape
    KH, KW, _, OC = weight_hwio.shape

    x = x_nhwc.astype(compute_dtype)
    if padding:
        x = jnp.pad(x, ((0, 0), (padding, padding), (padding, padding), (0, 0)))
    HP, WP = x.shape[1], x.shape[2]
    OH = (HP - dilation * (KH - 1) - 1) // stride + 1
    OW = (WP - dilation * (KW - 1) - 1) // stride + 1

    # im2col wrapper glue: one (M, KH*KW*Cin) patch matrix -> single big MXU matmul.
    cols = []
    for i in range(KH):
        for j in range(KW):
            h0, w0 = i * dilation, j * dilation
            cols.append(jax.lax.slice(
                x, (0, h0, w0, 0),
                (N, h0 + (OH - 1) * stride + 1, w0 + (OW - 1) * stride + 1, Cin),
                (1, stride, stride, 1)))
    patches = jnp.concatenate(cols, axis=-1).reshape(N * OH * OW, KH * KW * Cin)

    wmat = weight_hwio.reshape(KH * KW * Cin, OC)
    out = pallas_matmul_bias(patches, wmat, bias, epilogue=epilogue,
                             compute_dtype=compute_dtype, out_dtype=out_dtype)
    return out.reshape(N, OH, OW, OC)


# ----------------------------------------------------------------------------
# Kernel 2: 2x2 max pool, blocked, lane-dense output
# ----------------------------------------------------------------------------
def _maxpool2x2_kernel(x_ref, o_ref, *, w2, c):
    """x block: (rt, 2*W*C) = [h-even | h-odd] rows packed into lanes.
    Output block: (rt, W2*C) (lane-dense)."""
    wc = 2 * w2 * c                      # W * C
    for j in range(w2):
        h0 = x_ref[:, (2 * j) * c:(2 * j + 2) * c]           # (rt, 2C) h-even
        h1 = x_ref[:, wc + (2 * j) * c:wc + (2 * j + 2) * c]  # (rt, 2C) h-odd
        m = jnp.maximum(h0, h1)                               # H-pair max
        o_ref[:, j * c:(j + 1) * c] = jnp.maximum(m[:, :c], m[:, c:])  # W-pair


def pallas_maxpool2x2(x_nhwc, *, row_tile=256):
    """F.max_pool2d(x, 2) on NHWC, blocked over N*H/2 rows (pipelined)."""
    N, H, W, C = x_nhwc.shape
    assert H % 2 == 0 and W % 2 == 0
    H2, W2 = H // 2, W // 2
    rows = N * H2
    x2 = x_nhwc.reshape(rows, 2 * W * C)                 # free reshape

    rt = min(row_tile, _round_up(rows, 16))
    rows_p = _round_up(rows, rt)
    if rows_p != rows:
        x2 = jnp.pad(x2, ((0, rows_p - rows), (0, 0)))

    out = pl.pallas_call(
        functools.partial(_maxpool2x2_kernel, w2=W2, c=C),
        out_shape=jax.ShapeDtypeStruct((rows_p, W2 * C), x_nhwc.dtype),
        grid_spec=pltpu.PrefetchScalarGridSpec(
            num_scalar_prefetch=0, grid=(rows_p // rt,),
            in_specs=[pl.BlockSpec((rt, 2 * W * C), lambda i: (i, 0))],
            out_specs=pl.BlockSpec((rt, W2 * C), lambda i: (i, 0))),
        compiler_params=pltpu.CompilerParams(
            dimension_semantics=("parallel",),
            vmem_limit_bytes=32 * 1024 * 1024),
    )(x2)
    return out[:rows].reshape(N, H2, W2, C)


# ----------------------------------------------------------------------------
# Kernel 3: total Gaussian KL (constant prior sigma folded to scalars)
# ----------------------------------------------------------------------------
def _gaussian_kl_kernel(mu_q_ref, rho_q_ref, mu_p_ref, o_ref, acc_ref, *,
                        inv_sp_p, log_sp_p):
    @pl.when(pl.program_id(0) == 0)
    def _init():
        acc_ref[...] = jnp.zeros_like(acc_ref)

    sp_q = jax.nn.softplus(rho_q_ref[...])
    term1 = 2.0 * (log_sp_p - jnp.log(sp_q))                 # log(sig_p^2/sig_q^2)
    diff = (mu_q_ref[...] - mu_p_ref[...]) * inv_sp_p
    ratio = sp_q * inv_sp_p
    kl = 0.5 * (term1 + diff * diff + ratio * ratio - 1.0)   # padded elems -> 0
    # Partial reduce with VPU adds only (sublane-group sum into (8,128) acc).
    r = kl.shape[0]
    acc_ref[...] += jnp.sum(kl.reshape(r // 8, 8, 128), axis=0)

    @pl.when(pl.program_id(0) == pl.num_programs(0) - 1)
    def _finalize():
        o_ref[...] = jnp.sum(acc_ref[...], keepdims=True)    # single XLU reduce


def pallas_gaussian_kl_total(mu_q_list, rho_q_list, mu_p_list, rho_prior,
                             *, row_tile=2048):
    """Sum over all layers of KL(N(mu_q, sp(rho_q)^2) || N(mu_p, sp(rho_prior)^2)).
    The prior rho is the constant rho_prior in this module, so softplus(rho_prior)
    is folded to scalars and the rho_p array input is dropped entirely."""
    sp_p = float(np.log1p(np.exp(rho_prior)))
    inv_sp_p = 1.0 / sp_p
    log_sp_p = float(np.log(sp_p))

    def flat(lst):
        return jnp.concatenate([jnp.ravel(a).astype(jnp.float32) for a in lst])

    mu_q, rho_q, mu_p = flat(mu_q_list), flat(rho_q_list), flat(mu_p_list)
    n = mu_q.shape[0]
    lanes = 128
    rows = pl.cdiv(n, lanes)
    tr = min(row_tile, _round_up(rows, 8))
    rows_p = _round_up(rows, tr)
    total = rows_p * lanes

    def to_block(v, fill):
        return jnp.pad(v, (0, total - n),
                       constant_values=fill).reshape(rows_p, lanes)

    out = pl.pallas_call(
        functools.partial(_gaussian_kl_kernel, inv_sp_p=inv_sp_p,
                          log_sp_p=log_sp_p),
        out_shape=jax.ShapeDtypeStruct((1, 1), jnp.float32),
        grid_spec=pltpu.PrefetchScalarGridSpec(
            num_scalar_prefetch=0, grid=(rows_p // tr,),
            in_specs=[pl.BlockSpec((tr, lanes), lambda i: (i, 0))] * 3,
            out_specs=pl.BlockSpec((1, 1), lambda i: (0, 0)),
            scratch_shapes=[pltpu.VMEM((8, lanes), jnp.float32)]),
        compiler_params=pltpu.CompilerParams(
            dimension_semantics=("arbitrary",),
            vmem_limit_bytes=32 * 1024 * 1024),
    )(to_block(mu_q, 0.0),
      to_block(rho_q, float(rho_prior)),   # pad rho_q with rho_prior -> KL pad = 0
      to_block(mu_p, 0.0))
    return out[0, 0]


# ----------------------------------------------------------------------------
# Parameter init (mirrors the PyTorch constructors; compute-friendly layouts)
# ----------------------------------------------------------------------------
def _make_prob_params(key, w_shape, out_features, sigma_w, rho_prior):
    w_mu = sigma_w * jax.random.truncated_normal(key, -2.0, 2.0, w_shape, jnp.float32)
    b_mu = jnp.zeros((out_features,), jnp.float32)
    w_rho = jnp.full(w_shape, rho_prior, jnp.float32)
    b_rho = jnp.full((out_features,), rho_prior, jnp.float32)
    # prior rho == rho_prior (constant) is folded into the KL kernel, so only
    # the prior means need to be stored.
    return dict(weight_mu=w_mu, weight_rho=w_rho, bias_mu=b_mu, bias_rho=b_rho,
                weight_prior_mu=w_mu, bias_prior_mu=b_mu)


def init_prob_conv2d(key, in_channels, out_channels, kernel_size, rho_prior):
    in_features = in_channels * kernel_size * kernel_size
    shape = (kernel_size, kernel_size, in_channels, out_channels)   # HWIO
    return _make_prob_params(key, shape, out_channels,
                             1.0 / np.sqrt(in_features), rho_prior)


def init_prob_linear(key, in_features, out_features, rho_prior):
    shape = (in_features, out_features)                              # (K, N)
    return _make_prob_params(key, shape, out_features,
                             1.0 / np.sqrt(in_features), rho_prior)


def init_prob_cnnet4l(key, rho_prior, num_classes=10):
    k1, k2, k3, k4 = jax.random.split(key, 4)
    return dict(conv1=init_prob_conv2d(k1, 1, 32, 3, rho_prior),
                conv2=init_prob_conv2d(k2, 32, 64, 3, rho_prior),
                fc1=init_prob_linear(k3, 9216, 128, rho_prior),
                fc2=init_prob_linear(k4, 128, num_classes, rho_prior))


# ----------------------------------------------------------------------------
# ProbCNNet4l forward
# ----------------------------------------------------------------------------
_LAYERS = ("conv1", "conv2", "fc1", "fc2")


def prob_cnnet4l_forward(params, x_nchw, *, rho_prior=None, sample=False,
                         training=False, key=None, clamping=True, pmin=1e-4):
    """Mirrors ProbCNNet4l.forward(x, sample). Returns (log_probs, kl_div)."""
    # --- weights: posterior mean (eval) or Gaussian posterior sample ----------
    weights, biases = {}, {}
    if training or sample:
        assert key is not None
        keys = jax.random.split(key, 2 * len(_LAYERS))
    for idx, name in enumerate(_LAYERS):
        p = params[name]
        if training or sample:
            kw_, kb_ = keys[2 * idx], keys[2 * idx + 1]
            weights[name] = p["weight_mu"] + jax.nn.softplus(p["weight_rho"]) * \
                jax.random.normal(kw_, p["weight_mu"].shape, jnp.float32)
            biases[name] = p["bias_mu"] + jax.nn.softplus(p["bias_rho"]) * \
                jax.random.normal(kb_, p["bias_mu"].shape, jnp.float32)
        else:
            weights[name], biases[name] = p["weight_mu"], p["bias_mu"]

    # --- KL (training only): all layers' weight+bias KLs fused in one call ----
    kl_div = None
    if training:
        assert rho_prior is not None
        mu_q, rho_q, mu_p = [], [], []
        for name in _LAYERS:
            p = params[name]
            for kind in ("weight", "bias"):
                mu_q.append(p[f"{kind}_mu"])
                rho_q.append(p[f"{kind}_rho"])
                mu_p.append(p[f"{kind}_prior_mu"])
        kl_div = pallas_gaussian_kl_total(mu_q, rho_q, mu_p, rho_prior)

    # --- network body (NHWC, bf16 activations between kernels) ----------------
    cd = jnp.bfloat16
    h = jnp.transpose(x_nchw, (0, 2, 3, 1))                      # NCHW -> NHWC
    h = pallas_conv2d_nhwc(h, weights["conv1"], biases["conv1"],
                           epilogue="relu", compute_dtype=cd, out_dtype=cd)
    h = pallas_conv2d_nhwc(h, weights["conv2"], biases["conv2"],
                           epilogue="relu", compute_dtype=cd, out_dtype=cd)
    h = pallas_maxpool2x2(h)                                     # (N, 12, 12, 64)
    n = h.shape[0]
    h = h.reshape(n, -1)      # NHWC flatten; fc1 rows are stored in this order
    h = pallas_matmul_bias(h, weights["fc1"], biases["fc1"],
                           epilogue="relu", compute_dtype=cd, out_dtype=cd)
    out = pallas_matmul_bias(
        h, weights["fc2"], biases["fc2"],
        epilogue="log_softmax_clamp",
        log_pmin=(float(np.log(pmin)) if clamping else None),
        compute_dtype=cd, out_dtype=jnp.float32)
    return out, kl_div


# ----------------------------------------------------------------------------
# Pure-JAX references (for the self-test)
# ----------------------------------------------------------------------------
def reference_forward(params, x_nchw, *, clamping=True, pmin=1e-4,
                      compute_dtype=jnp.bfloat16):
    hp = jax.lax.Precision.HIGHEST
    cd = compute_dtype

    def conv_relu(p, x):
        y = jax.lax.conv_general_dilated(
            x.astype(cd), p["weight_mu"].astype(cd), (1, 1), [(0, 0), (0, 0)],
            dimension_numbers=("NHWC", "HWIO", "NHWC"),
            preferred_element_type=jnp.float32, precision=hp)
        return jax.nn.relu(y + p["bias_mu"].reshape(1, 1, 1, -1)).astype(cd)

    h = jnp.transpose(x_nchw, (0, 2, 3, 1))
    h = conv_relu(params["conv1"], h)
    h = conv_relu(params["conv2"], h)
    n, hh, ww, c = h.shape
    h = h.reshape(n, hh // 2, 2, ww // 2, 2, c).max(axis=(2, 4))   # maxpool 2x2
    h = h.reshape(n, -1)                                           # NHWC flatten
    h = jnp.dot(h.astype(cd), params["fc1"]["weight_mu"].astype(cd),
                preferred_element_type=jnp.float32, precision=hp)
    h = jax.nn.relu(h + params["fc1"]["bias_mu"]).astype(cd)
    logits = jnp.dot(h.astype(cd), params["fc2"]["weight_mu"].astype(cd),
                     preferred_element_type=jnp.float32, precision=hp)
    logits = logits + params["fc2"]["bias_mu"]
    out = jax.nn.log_softmax(logits, axis=1)
    if clamping:
        out = jnp.maximum(out, jnp.log(pmin))
    return out


def reference_kl(params, rho_prior):
    sig_p = jax.nn.softplus(jnp.float32(rho_prior))
    b0 = sig_p ** 2
    total = jnp.float32(0.0)
    for name in _LAYERS:
        p = params[name]
        for kind in ("weight", "bias"):
            sig_q = jax.nn.softplus(p[f"{kind}_rho"])
            b1 = sig_q ** 2
            kl = 0.5 * (jnp.log(b0 / b1)
                        + (p[f"{kind}_mu"] - p[f"{kind}_prior_mu"]) ** 2 / b0
                        + b1 / b0 - 1.0)
            total = total + jnp.sum(kl)
    return total


# ----------------------------------------------------------------------------
# Demo / correctness check
# ----------------------------------------------------------------------------
if __name__ == "__main__":
    key = jax.random.PRNGKey(0)
    k_init, k_x, k_sample = jax.random.split(key, 3)

    rho_prior = float(np.log(np.exp(0.03) - 1.0))   # typical pbb value
    num_classes = 10
    params = init_prob_cnnet4l(k_init, rho_prior, num_classes=num_classes)

    # ProbCNNet4l is MNIST-specific: fc1 expects 9216 = 64*12*12 -> 1x28x28 input.
    x = jax.random.normal(k_x, (2, 1, 28, 28), jnp.float32)

    # --- eval path: deterministic forward with posterior means ----------------
    out_eval, _ = prob_cnnet4l_forward(params, x, sample=False, training=False)
    out_eval = jax.block_until_ready(out_eval)
    ref = reference_forward(params, x)
    assert out_eval.shape == (2, num_classes)
    err = float(np.max(np.abs(np.asarray(out_eval) - np.asarray(ref))))
    assert np.allclose(np.asarray(out_eval), np.asarray(ref),
                       atol=5e-3, rtol=5e-3), f"max abs err = {err}"

    # --- training path: perturb the posterior so KL is non-trivial ------------
    params_t = {}
    for name in _LAYERS:
        p = params[name]
        params_t[name] = dict(
            weight_mu=p["weight_mu"] + 0.01,
            weight_rho=p["weight_rho"] + 0.3,
            bias_mu=p["bias_mu"] - 0.02,
            bias_rho=p["bias_rho"] + 0.1,
            weight_prior_mu=p["weight_prior_mu"],
            bias_prior_mu=p["bias_prior_mu"])

    out_train, kl = prob_cnnet4l_forward(params_t, x, rho_prior=rho_prior,
                                         sample=True, training=True, key=k_sample)
    out_train, kl = jax.block_until_ready((out_train, kl))
    kl_ref = float(reference_kl(params_t, rho_prior))
    assert out_train.shape == (2, num_classes)
    assert float(kl) > 0.0
    assert abs(float(kl) - kl_ref) <= 1e-3 * abs(kl_ref) + 1e-2, (float(kl), kl_ref)
    # log-probs are clamped at log(pmin) and never positive
    assert float(np.max(np.asarray(out_train))) <= 1e-6
    assert float(np.min(np.asarray(out_train))) >= float(np.log(1e-4)) - 1e-5

    print("KERNEL_OK")
</pallas_src>

<mosaic_0001>
module attributes {stable_mosaic.version = 11 : i64} {
  func.func @_matmul_bias_kernel(%arg0: i32, %arg1: i32, %arg2: i32, %arg3: memref<512x9xbf16, #tpu.memory_space<vmem>>, %arg4: memref<9x128xbf16, #tpu.memory_space<vmem>>, %arg5: memref<1x128xf32, #tpu.memory_space<vmem>>, %arg6: memref<512x128xbf16, #tpu.memory_space<vmem>>, %arg7: memref<512x128xf32, #tpu.memory_space<vmem>>) attributes {dimension_semantics = [#tpu.dimension_semantics<parallel>, #tpu.dimension_semantics<parallel>, #tpu.dimension_semantics<arbitrary>], iteration_bounds = array<i64: 3, 1, 1>, scalar_prefetch = 0 : i64, scratch_operands = 1 : i64, tpu.core_type = #tpu.core_type<tc>, window_params = [{transform_indices = @transform_0, window_bounds = array<i64: 512, 9>}, {transform_indices = @transform_1, window_bounds = array<i64: 9, 128>}, {transform_indices = @transform_2, window_bounds = array<i64: 1, 128>}, {transform_indices = @transform_3, window_bounds = array<i64: 512, 128>}]} {
    %c0_i32 = arith.constant 0 : i32
    %0 = arith.cmpi eq, %arg2, %c0_i32 : i32
    %1 = arith.extui %0 : i1 to i32
    %c0_i32_0 = arith.constant 0 : i32
    %2 = arith.cmpi ne, %1, %c0_i32_0 : i32
    scf.if %2 {
      %cst_10 = arith.constant 0.000000e+00 : f32
      %12 = vector.broadcast %cst_10 : f32 to vector<512x128xf32>
      %c0_11 = arith.constant 0 : index
      %c0_12 = arith.constant 0 : index
      %13 = vector.load %arg7[%c0_11, %c0_12] : memref<512x128xf32, #tpu.memory_space<vmem>>, vector<512x128xf32>
      tpu.vector_store %arg7[%c0_11, %c0_12], %12 {strides = array<i32>} : memref<512x128xf32, #tpu.memory_space<vmem>>, vector<512x128xf32>,
    } else {
    }
    %c0 = arith.constant 0 : index
    %c0_1 = arith.constant 0 : index
    %3 = vector.load %arg7[%c0, %c0_1] : memref<512x128xf32, #tpu.memory_space<vmem>>, vector<512x128xf32>
    %c0_2 = arith.constant 0 : index
    %c0_3 = arith.constant 0 : index
    %4 = vector.load %arg3[%c0_2, %c0_3] : memref<512x9xbf16, #tpu.memory_space<vmem>>, vector<512x9xbf16>
    %c0_4 = arith.constant 0 : index
    %c0_5 = arith.constant 0 : index
    %5 = vector.load %arg4[%c0_4, %c0_5] : memref<9x128xbf16, #tpu.memory_space<vmem>>, vector<9x128xbf16>
    %cst = arith.constant dense<0.000000e+00> : vector<512x128xf32>
    %6 = tpu.matmul %4, %5, %cst {dimension_numbers = #tpu.dot_dimension_numbers<[1], [0], [0], [1], [0, 0, 1, 1], [], []>} : vector<512x9xbf16>, vector<9x128xbf16>, vector<512x128xf32> -> vector<512x128xf32>
    %7 = arith.addf %3, %6 : vector<512x128xf32>
    %c0_6 = arith.constant 0 : index
    %c0_7 = arith.constant 0 : index
    %8 = vector.load %arg7[%c0_6, %c0_7] : memref<512x128xf32, #tpu.memory_space<vmem>>, vector<512x128xf32>
    tpu.vector_store %arg7[%c0_6, %c0_7], %7 {strides = array<i32>} : memref<512x128xf32, #tpu.memory_space<vmem>>, vector<512x128xf32>,
    %c0_i32_8 = arith.constant 0 : i32
    %9 = arith.cmpi eq, %arg2, %c0_i32_8 : i32
    %10 = arith.extui %9 : i1 to i32
    %c0_i32_9 = arith.constant 0 : i32
    %11 = arith.cmpi ne, %10, %c0_i32_9 : i32
    scf.if %11 {
      %c0_10 = arith.constant 0 : index
      %c0_11 = arith.constant 0 : index
      %12 = vector.load %arg7[%c0_10, %c0_11] : memref<512x128xf32, #tpu.memory_space<vmem>>, vector<512x128xf32>
      %c0_12 = arith.constant 0 : index
      %c0_13 = arith.constant 0 : index
      %13 = vector.load %arg5[%c0_12, %c0_13] : memref<1x128xf32, #tpu.memory_space<vmem>>, vector<1x128xf32>
      %14 = vector.broadcast %13 : vector<1x128xf32> to vector<512x128xf32>
      %15 = arith.addf %12, %14 : vector<512x128xf32>
      %cst_14 = arith.constant 0.000000e+00 : f32
      %16 = vector.broadcast %cst_14 : f32 to vector<512x128xf32>
      %17 = arith.maximumf %15, %16 : vector<512x128xf32>
      %18 = arith.truncf %17 : vector<512x128xf32> to vector<512x128xbf16>
      %c0_15 = arith.constant 0 : index
      %c0_16 = arith.constant 0 : index
      %19 = vector.load %arg6[%c0_15, %c0_16] : memref<512x128xbf16, #tpu.memory_space<vmem>>, vector<512x128xbf16>
      tpu.vector_store %arg6[%c0_15, %c0_16], %18 {strides = array<i32>} : memref<512x128xbf16, #tpu.memory_space<vmem>>, vector<512x128xbf16>,
    } else {
    }
    return
  }
  func.func @transform_0(%arg0: i32, %arg1: i32, %arg2: i32) -> (i32, i32) {
    %c0_i32 = arith.constant 0 : i32
    return %arg0, %arg2 : i32, i32
  }
  func.func @transform_1(%arg0: i32, %arg1: i32, %arg2: i32) -> (i32, i32) {
    %c0_i32 = arith.constant 0 : i32
    return %arg2, %arg1 : i32, i32
  }
  func.func @transform_2(%arg0: i32, %arg1: i32, %arg2: i32) -> (i32, i32) {
    %c0_i32 = arith.constant 0 : i32
    %c0_i32_0 = arith.constant 0 : i32
    return %c0_i32, %arg1 : i32, i32
  }
  func.func @transform_3(%arg0: i32, %arg1: i32, %arg2: i32) -> (i32, i32) {
    %c0_i32 = arith.constant 0 : i32
    return %arg0, %arg1 : i32, i32
  }
}

</mosaic_0001>

<bundles_post_ra>
// kernel: tpu_custom_call.1
= control target key start
LH: loop header
LB: loop body
LE: loop exit
PB: predicated region body
PF: predicated region fallthrough
CT: control target
= control target key end

     0   :  { %8 = vsyncpa [#allocation4], 0  ;;  %s2313_s0 = inlined_call_operand.vmem [shape: bf16[1536,9], index: 0, kind: input, shape index: {}]   ;;  %s2314_s1 = inlined_call_operand.vmem [shape: bf16[9,128], index: 1, kind: input, shape index: {}]   ;;  %s2315_s2 = inlined_call_operand.vmem [shape: f32[1,128], index: 2, kind: input, shape index: {}]   ;;  %s2316_s3 = inlined_call_operand.hbm [shape: bf16[1536,128], index: 3, kind: output, shape index: {}]  }
   0x1   :  { %10 = vsyncpa [#allocation4 + $0x1], 0  ;;  %s2037_s12 = smov 0   ;;  %s2039_s13 = smov 0  }
   0x2   :  { %s2041_s14 = smov 0   ;;  %s2043_s15 = smov 0  }
   0x3   :  { %s2045_s16 = smov 0   ;;  %s2047_s17 = smov 0  }
   0x4 LB: > { %s1468_s18 = sadd.s32 4294967295, %s2012_s17   ;;  %s1469_s19 = sadd.s32 4294967294, %s2012_s17   ;;  %s2012_s17 = sphi %s2047_s17, %s16_s17   ;;  %s2008_s16 = sphi %s2045_s16, %s2323_s16   ;;  %s2004_s15 = sphi %s2043_s15, %s2322_s15   ;;  %s2000_s14 = sphi %s2041_s14, %s2321_s14   ;;  %s1996_s13 = sphi %s2039_s13, %s2320_s13   ;;  %s1992_s12 = sphi %s2037_s12, %s2319_s12  }
   0x5   : > { %s35_s20 = sadd.s32 1, %s2008_s16  ;;  %s126_s21 = sadd.s32 1, %s2000_s14 }
   0x6   : > { %p37_p0 = scmp.ge.s32.totalorder %s35_s20, 3  ;;  %p136_p1 = scmp.ne.s32.totalorder %s2000_s14, %s1996_s13 }
   0x7   : > { %p137_p2 = scmp.eq.s32.totalorder %s1468_s18, 2  ;;  %p142_p3 = scmp.ne.s32.totalorder %s1996_s13, %s1992_s12 }
   0x8   : > { %s2325_s20 = smov (%p37_p0, %s35_s20), 0  ;;  %p143_p5 = scmp.eq.s32.totalorder %s1469_s19, 2 }
   0x9   : > { %p2077_p4 = por %p137_p2, %p136_p1  ;;  %s121_s23 = ssub.s32 %s2008_s16, %s2325_s20 }
   0xa   : > { %p1474_p6 = scmp.ge.s32.totalorder %s2012_s17, 1  ;;  %p124_p7 = scmp.eq.s32.totalorder %s121_s23, 0 }
   0xb   : > { %p2084_p8 = por %p143_p5, %p142_p3  ;;  %p191_p9 = scmp.lt.s32.totalorder %s2012_s17, 4 }
   0xc   : > { %s2090_s25 = scalar_select %p124_p7, %s2000_s14, %s126_s21  }
   0xd   : > { %p192_p10 = pnand %p1474_p6, %p191_p9 }
   0xe   : > { %s1476_s30 = sshll.u32 (!%p192_p10), %s2004_s15, 6  ;;  %s226_s10 = sand.u32 (!%p192_p10), 1, %s1996_s13  }
   0xf   : > { %195 = sbr.rel (%p192_p10) target bundleno = 293 (0x125), region = 32  ;;  %p230_p11 = scmp.lt.s32.totalorder (!%p192_p10), %s1476_s30, 191 }
  0x10   : > { %s1475_s11 = sshll.u32 (!%p192_p10), %s226_s10, 8  ;;  %s1680_s19 = sshll.u32 (!%p192_p10), %s2004_s15, 8 }
  0x11   : > { %s2182_s18 = scalar_lea.vmem (!%p192_p10), [#allocation3], %s1475_s11  ;;  %s1356_s26 = scalar_lea.hbm (!%p192_p10), %s2316_s3, %s1680_s19 }
  0x12   : > { %s1357_s15 = sshll.u32 (!%p192_p10), %s2182_s18, 4  ;;  %s1359_s27 = sshll.u32 (!%p192_p10), %s1356_s26, 4  ;;  %s1358_s15 = int_to_ptr.vmem [resolvable:$true] %s1357_s15  ;;  %s1360_s27 = int_to_ptr.hbm [resolvable:$true] %s1359_s27 }
  0x13   : > { %s1344_s28 = scalar_lea.sflag (!%p192_p10), [#allocation4], %s226_s10  ;;  %s1948_s29 = sshra.s32 (!%p192_p10), %s1360_s27, 4  ;;  %s1949_s29 = int_to_ptr.hbm [resolvable:$true] %s1948_s29 }
  0x14   : > { %v1608_v0 = vld [vmem:[%s2314_s1] sm:$0xf]  ;;  %v1679_v1 = vld [vmem:[%s2314_s1] sm:$0x10]  ;;  %vm712_vm0 = vcmask 1043456   ;;  %vm713_vm1 = vcmask 1044480   ;;  %p1955_p1 = scmp.lt.s32.totalorder %s1949_s29, %s2316_s3 }
  0x15   : > { %v1609_v2 = vor.u32 %v1679_v1, %v1608_v0  ;;  %v2014_v3 = vmov 65535   ;;  %s2327_s30 = smov (!%p230_p11, %s1476_s30), 191  ;;  %vm615_vm2 = vcmask 72704   ;;  %v2171_v41 = vld [vmem:[%s2315_s2] ss:$0 sm:$0xff]  ;;  %s1954_s6 = scalar_lea.hbm %s2316_s3, 768 }
  0x16   : > { %v714_v4 = vsel %vm712_vm0, 4294967295, %v2014_v3  ;;  %s1477_s4 = sshll.u32 %s2327_s30, 2  ;;  %s1950_s30 = scalar_lea.hbm %s1949_s29, 256 }
  0x17   : > { %v715_v5 = vsel %vm713_vm1, %v714_v4, 0  ;;  %s2102_s7 = scalar_lea.vmem %s2313_s0, %s1477_s4  ;;  %p1951_p12 = scmp.ne.s32.totalorder %s1949_s29, %s1950_s30 }
  0x18   : > { %v717_v6 = vand.u32 %v1609_v2, %v715_v5  ;;  %v1647_v7 = vld [vmem:[%s2102_s7] sm:$0xff]  ;;  %v1648_v11 = vld [vmem:[%s2102_s7 + $0x8] sm:$0xff]  ;;  %v1649_v15 = vld [vmem:[%s2102_s7 + $0x10] sm:$0xff]  ;;  %p1956_p2 = scmp.lt.s32.totalorder %s1954_s6, %s1950_s30 }
  0x19   : > { %v1655_v8 = vld [vmem:[%s2102_s7 + $0x40] sm:$0xff]  ;;  %v1656_v12 = vld [vmem:[%s2102_s7 + $0x48] sm:$0xff]  ;;  %v1657_v16 = vld [vmem:[%s2102_s7 + $0x50] sm:$0xff]  ;;  %p1952_p13 = pnand %p1951_p12, %p2077_p4 }
  0x1a   : > { %726 = vmatpush.bf16.msra.mxu0 %v717_v6  ;;  %1872 = vmatpush.bf16.msra.mxu1 %v717_v6  ;;  %v1663_v9 = vld [vmem:[%s2102_s7 + $0x80] sm:$0xff]  ;;  %v1664_v13 = vld [vmem:[%s2102_s7 + $0x88] sm:$0xff]  ;;  %v1665_v17 = vld [vmem:[%s2102_s7 + $0x90] sm:$0xff]  ;;  %p1957_p3 = por %p1956_p2, %p1955_p1 }
  0x1b   : > { %1873 = vmatpush.bf16.msra.mxu2 %v717_v6  ;;  %1874 = vmatpush.bf16.msra.mxu3 %v717_v6  ;;  %v1671_v10 = vld [vmem:[%s2102_s7 + $0xc0] sm:$0xff]  ;;  %v1672_v14 = vld [vmem:[%s2102_s7 + $0xc8] sm:$0xff]  ;;  %v1673_v18 = vld [vmem:[%s2102_s7 + $0xd0] sm:$0xff]  ;;  %p1953_p0 = pneg %p1952_p13 }
  0x1c   : > { %v1650_v19 = vld [vmem:[%s2102_s7 + $0x18] sm:$0xff]  ;;  %v1651_v23 = vld [vmem:[%s2102_s7 + $0x20] sm:$0xff]  ;;  %v1652_v27 = vld [vmem:[%s2102_s7 + $0x28] sm:$0xff] }
  0x1d   : > { %1610 = vmatmul.msk.bf16.vlgmr.msra.gmra.mxu0 %vm615_vm2, %v1647_v7  ;;  %1618 = vmatmul.msk.bf16.vlgmr.msra.gmra.mxu1 %vm615_vm2, %v1655_v8  ;;  %v1658_v20 = vld [vmem:[%s2102_s7 + $0x58] sm:$0xff]  ;;  %v1659_v24 = vld [vmem:[%s2102_s7 + $0x60] sm:$0xff]  ;;  %v1660_v28 = vld [vmem:[%s2102_s7 + $0x68] sm:$0xff]  ;;  %p1958_p5 = pnand %p1957_p3, %p1953_p0 }
  0x1e   : > { %1626 = vmatmul.msk.bf16.vlgmr.msra.gmra.mxu2 %vm615_vm2, %v1663_v9  ;;  %1634 = vmatmul.msk.bf16.vlgmr.msra.gmra.mxu3 %vm615_vm2, %v1671_v10  ;;  %v1666_v21 = vld [vmem:[%s2102_s7 + $0x98] sm:$0xff]  ;;  %v1667_v25 = vld [vmem:[%s2102_s7 + $0xa0] sm:$0xff]  ;;  %v1668_v29 = vld [vmem:[%s2102_s7 + $0xa8] sm:$0xff] }
  0x1f   : > { %v1674_v22 = vld [vmem:[%s2102_s7 + $0xd8] sm:$0xff]  ;;  %v1675_v26 = vld [vmem:[%s2102_s7 + $0xe0] sm:$0xff]  ;;  %v1676_v30 = vld [vmem:[%s2102_s7 + $0xe8] sm:$0xff] }
  0x20   : > { %v1653_v31 = vld [vmem:[%s2102_s7 + $0x30] sm:$0xff]  ;;  %v1654_v35 = vld [vmem:[%s2102_s7 + $0x38] sm:$0xff] }
  0x21   : > { %v1661_v32 = vld [vmem:[%s2102_s7 + $0x70] sm:$0xff]  ;;  %v1662_v36 = vld [vmem:[%s2102_s7 + $0x78] sm:$0xff] }
  0x22   : > { %v1669_v33 = vld [vmem:[%s2102_s7 + $0xb0] sm:$0xff]  ;;  %v1670_v37 = vld [vmem:[%s2102_s7 + $0xb8] sm:$0xff] }
  0x23   : > { %v1677_v34 = vld [vmem:[%s2102_s7 + $0xf0] sm:$0xff]  ;;  %v1678_v38 = vld [vmem:[%s2102_s7 + $0xf8] sm:$0xff] }
  0x2d   : > { %1611 = vmatmul.msk.bf16.gmra.mxu0 %vm615_vm2, %v1648_v11  ;;  %1619 = vmatmul.msk.bf16.gmra.mxu1 %vm615_vm2, %v1656_v12 }
  0x2e   : > { %1627 = vmatmul.msk.bf16.gmra.mxu2 %vm615_vm2, %v1664_v13  ;;  %1635 = vmatmul.msk.bf16.gmra.mxu3 %vm615_vm2, %v1672_v14 }
  0x3d   : > { %1612 = vmatmul.msk.bf16.gmra.mxu0 %vm615_vm2, %v1649_v15  ;;  %1620 = vmatmul.msk.bf16.gmra.mxu1 %vm615_vm2, %v1657_v16 }
  0x3e   : > { %1628 = vmatmul.msk.bf16.gmra.mxu2 %vm615_vm2, %v1665_v17  ;;  %1636 = vmatmul.msk.bf16.gmra.mxu3 %vm615_vm2, %v1673_v18 }
  0x4d   : > { %1613 = vmatmul.msk.bf16.gmra.mxu0 %vm615_vm2, %v1650_v19  ;;  %1621 = vmatmul.msk.bf16.gmra.mxu1 %vm615_vm2, %v1658_v20 }
  0x4e   : > { %1629 = vmatmul.msk.bf16.gmra.mxu2 %vm615_vm2, %v1666_v21  ;;  %1637 = vmatmul.msk.bf16.gmra.mxu3 %vm615_vm2, %v1674_v22 }
  0x5d   : > { %1614 = vmatmul.msk.bf16.gmra.mxu0 %vm615_vm2, %v1651_v23  ;;  %1622 = vmatmul.msk.bf16.gmra.mxu1 %vm615_vm2, %v1659_v24 }
  0x5e   : > { %1630 = vmatmul.msk.bf16.gmra.mxu2 %vm615_vm2, %v1667_v25  ;;  %1638 = vmatmul.msk.bf16.gmra.mxu3 %vm615_vm2, %v1675_v26 }
  0x6d   : > { %1615 = vmatmul.msk.bf16.gmra.mxu0 %vm615_vm2, %v1652_v27  ;;  %1623 = vmatmul.msk.bf16.gmra.mxu1 %vm615_vm2, %v1660_v28 }
  0x6e   : > { %1631 = vmatmul.msk.bf16.gmra.mxu2 %vm615_vm2, %v1668_v29  ;;  %1639 = vmatmul.msk.bf16.gmra.mxu3 %vm615_vm2, %v1676_v30 }
  0x7d   : > { %1616 = vmatmul.msk.bf16.gmra.mxu0 %vm615_vm2, %v1653_v31  ;;  %1624 = vmatmul.msk.bf16.gmra.mxu1 %vm615_vm2, %v1661_v32 }
  0x7e   : > { %1632 = vmatmul.msk.bf16.gmra.mxu2 %vm615_vm2, %v1669_v33  ;;  %1640 = vmatmul.msk.bf16.gmra.mxu3 %vm615_vm2, %v1677_v34 }
  0x8d   : > { %1617 = vmatmul.msk.bf16.gmra.mxu0 %vm615_vm2, %v1654_v35  ;;  %1625 = vmatmul.msk.bf16.gmra.mxu1 %vm615_vm2, %v1662_v36 }
  0x8e   : > { %1633 = vmatmul.msk.bf16.gmra.mxu2 %vm615_vm2, %v1670_v37  ;;  %1641 = vmatmul.msk.bf16.gmra.mxu3 %vm615_vm2, %v1678_v38 }
  0x9a   : > { %v728_v39 = vpop.f32.mrf.mxu0  ;;  %v768_v40 = vpop.f32.mrf.mxu1 }
  0x9b   : > { %v1087_v42 = vadd.f32 %v2171_v41, %v728_v39  ;;  %v1103_v43 = vadd.f32 %v2171_v41, %v768_v40 }
  0x9d   : > { %v1151_v50 = vmax.f32 %v1087_v42, 0.0  ;;  %v1167_v51 = vmax.f32 %v1103_v43, 0.0 }
  0xa1   : > { %v808_v44 = vpop.f32.mrf.mxu2  ;;  %v848_v45 = vpop.f32.mrf.mxu3 }
  0xa2   : > { %v730_v46 = vpop.f32.mrf.mxu0  ;;  %v770_v47 = vpop.f32.mrf.mxu1  ;;  %v1119_v56 = vadd.f32 %v2171_v41, %v808_v44  ;;  %v1135_v57 = vadd.f32 %v2171_v41, %v848_v45 }
  0xa3   : > { %v1088_v48 = vadd.f32 %v2171_v41, %v730_v46  ;;  %v1104_v49 = vadd.f32 %v2171_v41, %v770_v47 }
  0xa4   : > { %v1183_v0 = vmax.f32 %v1119_v56, 0.0  ;;  %v1199_v1 = vmax.f32 %v1135_v57, 0.0 }
  0xa5   : > { %v1152_v52 = vmax.f32 %v1088_v48, 0.0  ;;  %v1168_v53 = vmax.f32 %v1104_v49, 0.0 }
  0xa7   : > { %v1684_v54 = vpack.c.bf16 %v1152_v52, %v1151_v50  ;;  %v1724_v55 = vpack.c.bf16 %v1168_v53, %v1167_v51 }
  0xa9   : > { %1685 = vst [vmem:[%s2182_s18] sm:$0xff] %v1684_v54   ;;  %v810_v58 = vpop.f32.mrf.mxu2  ;;  %v850_v59 = vpop.f32.mrf.mxu3 }
  0xaa   : > { %1848 = vst [vmem:[%s2182_s18 + $0x40] sm:$0xff] %v1724_v55   ;;  %v1120_v60 = vadd.f32 %v2171_v41, %v810_v58  ;;  %v1136_v61 = vadd.f32 %v2171_v41, %v850_v59  ;;  %v733_v62 = vpop.f32.mrf.mxu0  ;;  %v773_v63 = vpop.f32.mrf.mxu1 }
  0xab   : > { %v1089_v6 = vadd.f32 %v2171_v41, %v733_v62  ;;  %v1105_v7 = vadd.f32 %v2171_v41, %v773_v63 }
  0xac   : > { %v1184_v2 = vmax.f32 %v1120_v60, 0.0  ;;  %v1200_v3 = vmax.f32 %v1136_v61, 0.0 }
  0xad   : > { %v1153_v14 = vmax.f32 %v1089_v6, 0.0  ;;  %v1169_v15 = vmax.f32 %v1105_v7, 0.0 }
  0xae   : > { %v1764_v4 = vpack.c.bf16 %v1184_v2, %v1183_v0  ;;  %v1804_v5 = vpack.c.bf16 %v1200_v3, %v1199_v1 }
  0xb0   : > { %1856 = vst [vmem:[%s2182_s18 + $0x80] sm:$0xff] %v1764_v4  }
  0xb1   : > { %1864 = vst [vmem:[%s2182_s18 + $0xc0] sm:$0xff] %v1804_v5   ;;  %v813_v8 = vpop.f32.mrf.mxu2  ;;  %v853_v9 = vpop.f32.mrf.mxu3 }
  0xb2   : > { %v735_v10 = vpop.f32.mrf.mxu0  ;;  %v775_v11 = vpop.f32.mrf.mxu1  ;;  %v1121_v20 = vadd.f32 %v2171_v41, %v813_v8  ;;  %v1137_v21 = vadd.f32 %v2171_v41, %v853_v9 }
  0xb3   : > { %v1090_v12 = vadd.f32 %v2171_v41, %v735_v10  ;;  %v1106_v13 = vadd.f32 %v2171_v41, %v775_v11 }
  0xb4   : > { %v1185_v28 = vmax.f32 %v1121_v20, 0.0  ;;  %v1201_v29 = vmax.f32 %v1137_v21, 0.0 }
  0xb5   : > { %v1154_v16 = vmax.f32 %v1090_v12, 0.0  ;;  %v1170_v17 = vmax.f32 %v1106_v13, 0.0 }
  0xb7   : > { %v1689_v18 = vpack.c.bf16 %v1154_v16, %v1153_v14  ;;  %v1729_v19 = vpack.c.bf16 %v1170_v17, %v1169_v15 }
  0xb9   : > { %1841 = vst [vmem:[%s2182_s18 + $0x8] sm:$0xff] %v1689_v18   ;;  %v815_v22 = vpop.f32.mrf.mxu2  ;;  %v855_v23 = vpop.f32.mrf.mxu3 }
  0xba   : > { %1849 = vst [vmem:[%s2182_s18 + $0x48] sm:$0xff] %v1729_v19   ;;  %v1122_v24 = vadd.f32 %v2171_v41, %v815_v22  ;;  %v1138_v25 = vadd.f32 %v2171_v41, %v855_v23  ;;  %v738_v26 = vpop.f32.mrf.mxu0  ;;  %v778_v27 = vpop.f32.mrf.mxu1 }
  0xbb   : > { %v1091_v34 = vadd.f32 %v2171_v41, %v738_v26  ;;  %v1107_v35 = vadd.f32 %v2171_v41, %v778_v27 }
  0xbc   : > { %v1186_v30 = vmax.f32 %v1122_v24, 0.0  ;;  %v1202_v31 = vmax.f32 %v1138_v25, 0.0 }
  0xbd   : > { %v1155_v43 = vmax.f32 %v1091_v34, 0.0  ;;  %v1171_v44 = vmax.f32 %v1107_v35, 0.0 }
  0xbe   : > { %v1769_v32 = vpack.c.bf16 %v1186_v30, %v1185_v28  ;;  %v1809_v33 = vpack.c.bf16 %v1202_v31, %v1201_v29 }
  0xc0   : > { %1857 = vst [vmem:[%s2182_s18 + $0x88] sm:$0xff] %v1769_v32  }
  0xc1   : > { %1865 = vst [vmem:[%s2182_s18 + $0xc8] sm:$0xff] %v1809_v33   ;;  %v818_v36 = vpop.f32.mrf.mxu2  ;;  %v858_v37 = vpop.f32.mrf.mxu3 }
  0xc2   : > { %v740_v38 = vpop.f32.mrf.mxu0  ;;  %v780_v39 = vpop.f32.mrf.mxu1  ;;  %v1123_v49 = vadd.f32 %v2171_v41, %v818_v36  ;;  %v1139_v50 = vadd.f32 %v2171_v41, %v858_v37 }
  0xc3   : > { %v1092_v40 = vadd.f32 %v2171_v41, %v740_v38  ;;  %v1108_v42 = vadd.f32 %v2171_v41, %v780_v39 }
  0xc4   : > { %v1187_v57 = vmax.f32 %v1123_v49, 0.0  ;;  %v1203_v58 = vmax.f32 %v1139_v50, 0.0 }
  0xc5   : > { %v1156_v45 = vmax.f32 %v1092_v40, 0.0  ;;  %v1172_v46 = vmax.f32 %v1108_v42, 0.0 }
  0xc7   : > { %v1694_v47 = vpack.c.bf16 %v1156_v45, %v1155_v43  ;;  %v1734_v48 = vpack.c.bf16 %v1172_v46, %v1171_v44 }
  0xc9   : > { %1842 = vst [vmem:[%s2182_s18 + $0x10] sm:$0xff] %v1694_v47   ;;  %v820_v51 = vpop.f32.mrf.mxu2  ;;  %v860_v52 = vpop.f32.mrf.mxu3 }
  0xca   : > { %1850 = vst [vmem:[%s2182_s18 + $0x50] sm:$0xff] %v1734_v48   ;;  %v1124_v53 = vadd.f32 %v2171_v41, %v820_v51  ;;  %v1140_v54 = vadd.f32 %v2171_v41, %v860_v52  ;;  %v743_v55 = vpop.f32.mrf.mxu0  ;;  %v783_v56 = vpop.f32.mrf.mxu1 }
  0xcb   : > { %v1093_v63 = vadd.f32 %v2171_v41, %v743_v55  ;;  %v1109_v0 = vadd.f32 %v2171_v41, %v783_v56 }
  0xcc   : > { %v1188_v59 = vmax.f32 %v1124_v53, 0.0  ;;  %v1204_v60 = vmax.f32 %v1140_v54, 0.0 }
  0xcd   : > { %v1157_v7 = vmax.f32 %v1093_v63, 0.0  ;;  %v1173_v8 = vmax.f32 %v1109_v0, 0.0 }
  0xce   : > { %v1774_v61 = vpack.c.bf16 %v1188_v59, %v1187_v57  ;;  %v1814_v62 = vpack.c.bf16 %v1204_v60, %v1203_v58 }
  0xd0   : > { %1858 = vst [vmem:[%s2182_s18 + $0x90] sm:$0xff] %v1774_v61  }
  0xd1   : > { %1866 = vst [vmem:[%s2182_s18 + $0xd0] sm:$0xff] %v1814_v62   ;;  %v823_v1 = vpop.f32.mrf.mxu2  ;;  %v863_v2 = vpop.f32.mrf.mxu3 }
  0xd2   : > { %v745_v3 = vpop.f32.mrf.mxu0  ;;  %v785_v4 = vpop.f32.mrf.mxu1  ;;  %v1125_v13 = vadd.f32 %v2171_v41, %v823_v1  ;;  %v1141_v14 = vadd.f32 %v2171_v41, %v863_v2 }
  0xd3   : > { %v1094_v5 = vadd.f32 %v2171_v41, %v745_v3  ;;  %v1110_v6 = vadd.f32 %v2171_v41, %v785_v4 }
  0xd4   : > { %v1189_v21 = vmax.f32 %v1125_v13, 0.0  ;;  %v1205_v22 = vmax.f32 %v1141_v14, 0.0 }
  0xd5   : > { %v1158_v9 = vmax.f32 %v1094_v5, 0.0  ;;  %v1174_v10 = vmax.f32 %v1110_v6, 0.0 }
  0xd7   : > { %v1699_v11 = vpack.c.bf16 %v1158_v9, %v1157_v7  ;;  %v1739_v12 = vpack.c.bf16 %v1174_v10, %v1173_v8 }
  0xd9   : > { %1843 = vst [vmem:[%s2182_s18 + $0x18] sm:$0xff] %v1699_v11   ;;  %v825_v15 = vpop.f32.mrf.mxu2  ;;  %v865_v16 = vpop.f32.mrf.mxu3 }
  0xda   : > { %1851 = vst [vmem:[%s2182_s18 + $0x58] sm:$0xff] %v1739_v12   ;;  %v1126_v17 = vadd.f32 %v2171_v41, %v825_v15  ;;  %v1142_v18 = vadd.f32 %v2171_v41, %v865_v16  ;;  %v748_v19 = vpop.f32.mrf.mxu0  ;;  %v788_v20 = vpop.f32.mrf.mxu1 }
  0xdb   : > { %v1095_v27 = vadd.f32 %v2171_v41, %v748_v19  ;;  %v1111_v28 = vadd.f32 %v2171_v41, %v788_v20 }
  0xdc   : > { %v1190_v23 = vmax.f32 %v1126_v17, 0.0  ;;  %v1206_v24 = vmax.f32 %v1142_v18, 0.0 }
  0xdd   : > { %v1159_v35 = vmax.f32 %v1095_v27, 0.0  ;;  %v1175_v36 = vmax.f32 %v1111_v28, 0.0 }
  0xde   : > { %v1779_v25 = vpack.c.bf16 %v1190_v23, %v1189_v21  ;;  %v1819_v26 = vpack.c.bf16 %v1206_v24, %v1205_v22 }
  0xe0   : > { %1859 = vst [vmem:[%s2182_s18 + $0x98] sm:$0xff] %v1779_v25  }
  0xe1   : > { %1867 = vst [vmem:[%s2182_s18 + $0xd8] sm:$0xff] %v1819_v26   ;;  %v828_v29 = vpop.f32.mrf.mxu2  ;;  %v868_v30 = vpop.f32.mrf.mxu3 }
  0xe2   : > { %v750_v31 = vpop.f32.mrf.mxu0  ;;  %v790_v32 = vpop.f32.mrf.mxu1  ;;  %v1127_v42 = vadd.f32 %v2171_v41, %v828_v29  ;;  %v1143_v43 = vadd.f32 %v2171_v41, %v868_v30 }
  0xe3   : > { %v1096_v33 = vadd.f32 %v2171_v41, %v750_v31  ;;  %v1112_v34 = vadd.f32 %v2171_v41, %v790_v32 }
  0xe4   : > { %v1191_v50 = vmax.f32 %v1127_v42, 0.0  ;;  %v1207_v51 = vmax.f32 %v1143_v43, 0.0 }
  0xe5   : > { %v1160_v37 = vmax.f32 %v1096_v33, 0.0  ;;  %v1176_v38 = vmax.f32 %v1112_v34, 0.0 }
  0xe7   : > { %v1704_v39 = vpack.c.bf16 %v1160_v37, %v1159_v35  ;;  %v1744_v40 = vpack.c.bf16 %v1176_v38, %v1175_v36 }
  0xe9   : > { %1844 = vst [vmem:[%s2182_s18 + $0x20] sm:$0xff] %v1704_v39   ;;  %v830_v44 = vpop.f32.mrf.mxu2  ;;  %v870_v45 = vpop.f32.mrf.mxu3 }
  0xea   : > { %1852 = vst [vmem:[%s2182_s18 + $0x60] sm:$0xff] %v1744_v40   ;;  %v1128_v46 = vadd.f32 %v2171_v41, %v830_v44  ;;  %v1144_v47 = vadd.f32 %v2171_v41, %v870_v45  ;;  %v753_v48 = vpop.f32.mrf.mxu0  ;;  %v793_v49 = vpop.f32.mrf.mxu1 }
  0xeb   : > { %v1097_v56 = vadd.f32 %v2171_v41, %v753_v48  ;;  %v1113_v57 = vadd.f32 %v2171_v41, %v793_v49 }
  0xec   : > { %v1192_v52 = vmax.f32 %v1128_v46, 0.0  ;;  %v1208_v53 = vmax.f32 %v1144_v47, 0.0 }
  0xed   : > { %v1161_v0 = vmax.f32 %v1097_v56, 0.0  ;;  %v1177_v1 = vmax.f32 %v1113_v57, 0.0 }
  0xee   : > { %v1784_v54 = vpack.c.bf16 %v1192_v52, %v1191_v50  ;;  %v1824_v55 = vpack.c.bf16 %v1208_v53, %v1207_v51 }
  0xf0   : > { %1860 = vst [vmem:[%s2182_s18 + $0xa0] sm:$0xff] %v1784_v54  }
  0xf1   : > { %1868 = vst [vmem:[%s2182_s18 + $0xe0] sm:$0xff] %v1824_v55   ;;  %v833_v58 = vpop.f32.mrf.mxu2  ;;  %v873_v59 = vpop.f32.mrf.mxu3 }
  0xf2   : > { %v755_v60 = vpop.f32.mrf.mxu0  ;;  %v795_v61 = vpop.f32.mrf.mxu1  ;;  %v1129_v6 = vadd.f32 %v2171_v41, %v833_v58  ;;  %v1145_v7 = vadd.f32 %v2171_v41, %v873_v59 }
  0xf3   : > { %v1098_v62 = vadd.f32 %v2171_v41, %v755_v60  ;;  %v1114_v63 = vadd.f32 %v2171_v41, %v795_v61 }
  0xf4   : > { %v1193_v14 = vmax.f32 %v1129_v6, 0.0  ;;  %v1209_v15 = vmax.f32 %v1145_v7, 0.0 }
  0xf5   : > { %v1162_v2 = vmax.f32 %v1098_v62, 0.0  ;;  %v1178_v3 = vmax.f32 %v1114_v63, 0.0 }
  0xf7   : > { %v1709_v4 = vpack.c.bf16 %v1162_v2, %v1161_v0  ;;  %v1749_v5 = vpack.c.bf16 %v1178_v3, %v1177_v1 }
  0xf9   : > { %1845 = vst [vmem:[%s2182_s18 + $0x28] sm:$0xff] %v1709_v4   ;;  %v835_v8 = vpop.f32.mrf.mxu2  ;;  %v875_v9 = vpop.f32.mrf.mxu3 }
  0xfa   : > { %1853 = vst [vmem:[%s2182_s18 + $0x68] sm:$0xff] %v1749_v5   ;;  %v1130_v10 = vadd.f32 %v2171_v41, %v835_v8  ;;  %v1146_v11 = vadd.f32 %v2171_v41, %v875_v9  ;;  %v758_v12 = vpop.f32.mrf.mxu0  ;;  %v798_v13 = vpop.f32.mrf.mxu1 }
  0xfb   : > { %v1099_v20 = vadd.f32 %v2171_v41, %v758_v12  ;;  %v1115_v21 = vadd.f32 %v2171_v41, %v798_v13 }
  0xfc   : > { %v1194_v16 = vmax.f32 %v1130_v10, 0.0  ;;  %v1210_v17 = vmax.f32 %v1146_v11, 0.0 }
  0xfd   : > { %v1163_v28 = vmax.f32 %v1099_v20, 0.0  ;;  %v1179_v29 = vmax.f32 %v1115_v21, 0.0 }
  0xfe   : > { %v1789_v18 = vpack.c.bf16 %v1194_v16, %v1193_v14  ;;  %v1829_v19 = vpack.c.bf16 %v1210_v17, %v1209_v15 }
 0x100   : > { %1861 = vst [vmem:[%s2182_s18 + $0xa8] sm:$0xff] %v1789_v18  }
 0x101   : > { %1869 = vst [vmem:[%s2182_s18 + $0xe8] sm:$0xff] %v1829_v19   ;;  %v838_v22 = vpop.f32.mrf.mxu2  ;;  %v878_v23 = vpop.f32.mrf.mxu3 }
 0x102   : > { %v760_v24 = vpop.f32.mrf.mxu0  ;;  %v800_v25 = vpop.f32.mrf.mxu1  ;;  %v1131_v34 = vadd.f32 %v2171_v41, %v838_v22  ;;  %v1147_v35 = vadd.f32 %v2171_v41, %v878_v23 }
 0x103   : > { %v1100_v26 = vadd.f32 %v2171_v41, %v760_v24  ;;  %v1116_v27 = vadd.f32 %v2171_v41, %v800_v25 }
 0x104   : > { %v1195_v43 = vmax.f32 %v1131_v34, 0.0  ;;  %v1211_v44 = vmax.f32 %v1147_v35, 0.0 }
 0x105   : > { %v1164_v30 = vmax.f32 %v1100_v26, 0.0  ;;  %v1180_v31 = vmax.f32 %v1116_v27, 0.0 }
 0x107   : > { %v1714_v32 = vpack.c.bf16 %v1164_v30, %v1163_v28  ;;  %v1754_v33 = vpack.c.bf16 %v1180_v31, %v1179_v29 }
 0x109   : > { %1846 = vst [vmem:[%s2182_s18 + $0x30] sm:$0xff] %v1714_v32   ;;  %v840_v36 = vpop.f32.mrf.mxu2  ;;  %v880_v37 = vpop.f32.mrf.mxu3 }
 0x10a   : > { %1854 = vst [vmem:[%s2182_s18 + $0x70] sm:$0xff] %v1754_v33   ;;  %v1132_v38 = vadd.f32 %v2171_v41, %v840_v36  ;;  %v1148_v39 = vadd.f32 %v2171_v41, %v880_v37  ;;  %v763_v40 = vpop.f32.mrf.mxu0  ;;  %v803_v42 = vpop.f32.mrf.mxu1 }
 0x10b   : > { %v1101_v49 = vadd.f32 %v2171_v41, %v763_v40  ;;  %v1117_v50 = vadd.f32 %v2171_v41, %v803_v42 }
 0x10c   : > { %v1196_v45 = vmax.f32 %v1132_v38, 0.0  ;;  %v1212_v46 = vmax.f32 %v1148_v39, 0.0 }
 0x10d   : > { %v1165_v57 = vmax.f32 %v1101_v49, 0.0  ;;  %v1181_v58 = vmax.f32 %v1117_v50, 0.0 }
 0x10e   : > { %v1794_v47 = vpack.c.bf16 %v1196_v45, %v1195_v43  ;;  %v1834_v48 = vpack.c.bf16 %v1212_v46, %v1211_v44 }
 0x110   : > { %1862 = vst [vmem:[%s2182_s18 + $0xb0] sm:$0xff] %v1794_v47  }
 0x111   : > { %1870 = vst [vmem:[%s2182_s18 + $0xf0] sm:$0xff] %v1834_v48   ;;  %v843_v51 = vpop.f32.mrf.mxu2  ;;  %v883_v52 = vpop.f32.mrf.mxu3 }
 0x112   : > { %v765_v53 = vpop.f32.mrf.mxu0  ;;  %v805_v54 = vpop.f32.mrf.mxu1  ;;  %v1133_v63 = vadd.f32 %v2171_v41, %v843_v51  ;;  %v1149_v0 = vadd.f32 %v2171_v41, %v883_v52 }
 0x113   : > { %v1102_v55 = vadd.f32 %v2171_v41, %v765_v53  ;;  %v1118_v56 = vadd.f32 %v2171_v41, %v805_v54 }
 0x114   : > { %v1197_v5 = vmax.f32 %v1133_v63, 0.0  ;;  %v1213_v6 = vmax.f32 %v1149_v0, 0.0 }
 0x115   : > { %v1166_v59 = vmax.f32 %v1102_v55, 0.0  ;;  %v1182_v60 = vmax.f32 %v1118_v56, 0.0 }
 0x117   : > { %v1719_v61 = vpack.c.bf16 %v1166_v59, %v1165_v57  ;;  %v1759_v62 = vpack.c.bf16 %v1182_v60, %v1181_v58 }
 0x119   : > { %1847 = vst [vmem:[%s2182_s18 + $0x38] sm:$0xff] %v1719_v61   ;;  %v845_v1 = vpop.f32.mrf.mxu2  ;;  %v885_v2 = vpop.f32.mrf.mxu3 }
 0x11a   : > { %1855 = vst [vmem:[%s2182_s18 + $0x78] sm:$0xff] %v1759_v62   ;;  %v1134_v3 = vadd.f32 %v2171_v41, %v845_v1  ;;  %v1150_v4 = vadd.f32 %v2171_v41, %v885_v2 }
 0x11c   : > { %v1198_v7 = vmax.f32 %v1134_v3, 0.0  ;;  %v1214_v8 = vmax.f32 %v1150_v4, 0.0 }
 0x11e   : > { %v1799_v9 = vpack.c.bf16 %v1198_v7, %v1197_v5  ;;  %v1839_v10 = vpack.c.bf16 %v1214_v8, %v1213_v6 }
 0x120   : > { %1863 = vst [vmem:[%s2182_s18 + $0xb8] sm:$0xff] %v1799_v9  }
 0x121   : > { %1871 = vst [vmem:[%s2182_s18 + $0xf8] sm:$0xff] %v1839_v10  }
 0x122   : > { %1961 = shalt.err (!%p1958_p5)
}
 0x123   : > { %s2015_s9 = smov 64   ;;  %s2016_s10 = smov 4  }
 0x124   : > { %1875 = dma.vmem_to_hbm [thread:$0]  (%p2077_p4), %s1358_s15, 4096, %s1360_s27, %s1344_s28, %s2015_s9, %s2015_s9, %s2016_s10  }
 0x125 PF: > { %p1881_p6 = scmp.ge.s32.totalorder %s2012_s17, 2  ;;  %s1374_s11 = sand.u32 1, %s1992_s12  }
 0x126   : > { %s1375_s18 = scalar_lea.sflag [#allocation4], %s1374_s11 }
 0x127   : > { %p1878_p7 = pnand %p1881_p6, %p2084_p8 }
 0x129   : > { %p1879_p9 = pneg %p1878_p7 }
 0x12b   : > { %1987 = dma.done.wait (%p1879_p9), %s1375_s18, 4096  }
 0x12c   : > { %1989 = vsyncadd (%p1879_p9), %s1375_s18, 4294963200  ;;  %s16_s17 = sadd.s32 1, %s2012_s17   ;;  %s2319_s12 = smov %s1996_s13 }
 0x12d   : > { %p13_p10 = scmp.ge.s32.totalorder %s16_s17, 5   ;;  %s2320_s13 = smov %s2000_s14 }
 0x12e   : > { %s2321_s14 = smov %s2090_s25  ;;  %s2322_s15 = smov %s2008_s16 }
 0x12f   : > { %s2323_s16 = smov %s2325_s20  ;;  %15 = sbr.rel (!%p13_p10) target bundleno = 4 (0x4), region = 81 }
 0x134   :  { %1381 = vsyncpa [#allocation4], 1 }
 0x135   :  { %1383 = vsyncpa [#allocation4 + $0x1], 1 }

</bundles_post_ra>
